<compile_context>
chip_gen: v5e
topology: v5e:2x2
jax: 0.10.0
libtpu: 0.0.40
codegen_flags: <defaults>
</compile_context>

<pallas_src>
import functools

import jax
import jax.numpy as jnp
from jax.experimental import pallas as pl
from jax.experimental.pallas import tpu as pltpu

HIDDEN = 128        # DQN3 hidden_dim (exactly one 128-lane tile)
LANES = 128         # lane-dense output / w3 / bias padding width
BF16_ROWS = 16      # bf16 sublane packing -> keep row counts / offsets 16-aligned


def _round_up(x, m):
    return (x + m - 1) // m * m


def dqn3_kernel(x_ref, w_ref, b_ref, o_ref, *, k1p):
    """Fused 3-layer MLP on one batch tile.

    x_ref: [TB, k1p]               bf16  (zero-padded input features)
    w_ref: [k1p + 2*HIDDEN, 128]   bf16  (w1 | w2 | w3 stacked along rows, zero-padded)
    b_ref: [8, 128]                f32   (rows 0,1,2 = b1,b2,b3; rest zero)
    o_ref: [TB, 128]               bf16  (lane-dense; cols >= action_dim sliced later)
    """
    x = x_ref[...]                                   # bf16
    w1 = w_ref[0:k1p, :]                             # static, 16-aligned slices
    w2 = w_ref[k1p:k1p + HIDDEN, :]
    w3 = w_ref[k1p + HIDDEN:k1p + 2 * HIDDEN, :]
    b1 = b_ref[0:1, :]
    b2 = b_ref[1:2, :]
    b3 = b_ref[2:3, :]

    # fc1 + ReLU  (bf16 MXU inputs, f32 accumulate, f32 bias/ReLU)
    h1 = jnp.dot(x, w1, preferred_element_type=jnp.float32)
    h1 = jnp.maximum(h1 + b1, 0.0)
    # fc2 + ReLU
    h2 = jnp.dot(h1.astype(jnp.bfloat16), w2, preferred_element_type=jnp.float32)
    h2 = jnp.maximum(h2 + b2, 0.0)
    # fc3 (lane-padded to 128 output columns, stored as bf16)
    h3 = jnp.dot(h2.astype(jnp.bfloat16), w3, preferred_element_type=jnp.float32)
    o_ref[...] = (h3 + b3).astype(o_ref.dtype)


def pack_params(params, state_dim):
    """Pack (w1,b1,w2,b2,w3,b3) into one bf16 weight blob + one f32 bias blob.

    Called ONCE (outside the hot path); the blobs are reused for every forward call.
    """
    w1, b1, w2, b2, w3, b3 = (params[k] for k in ("w1", "b1", "w2", "b2", "w3", "b3"))
    hidden = w2.shape[0]
    action_dim = w3.shape[1]
    assert hidden == HIDDEN, "kernel assumes DQN3 default hidden_dim=128"
    assert action_dim <= LANES

    k1p = _round_up(max(state_dim, 1), BF16_ROWS)

    w1p = jnp.zeros((k1p, HIDDEN), jnp.float32).at[:state_dim, :].set(w1)
    w3p = jnp.zeros((HIDDEN, LANES), jnp.float32).at[:, :action_dim].set(w3)
    w_blob = jnp.concatenate([w1p, w2, w3p], axis=0).astype(jnp.bfloat16)

    b_blob = jnp.zeros((8, LANES), jnp.float32)
    b_blob = b_blob.at[0, :HIDDEN].set(b1.reshape(-1))
    b_blob = b_blob.at[1, :HIDDEN].set(b2.reshape(-1))
    b_blob = b_blob.at[2, :action_dim].set(b3.reshape(-1))
    return w_blob, b_blob, k1p, action_dim


def dqn3_forward(x, w_blob, b_blob, *, k1p, action_dim, block_b=1024,
                 slice_output=True):
    """x: [B, state_dim] f32; packed blobs from pack_params. Returns [B, action_dim] f32.

    With slice_output=False the padded [b_pad, 128] bf16 block is returned so a
    downstream consumer (e.g. argmax over Q-values) can index lanes itself and the
    extra slice/copy of the output never materializes.
    """
    B, state_dim = x.shape
    assert state_dim <= k1p
    kw = w_blob.shape[0]

    # Batch handling: pad only to a multiple of 16 (bf16 sublanes); the grid uses
    # cdiv so the tile size never forces extra padded rows.
    b_pad = _round_up(B, BF16_ROWS)
    block_b = max(BF16_ROWS, min(_round_up(block_b, BF16_ROWS), 2048))  # v5e VMEM guard
    tb = min(block_b, b_pad)
    # v7x has 2 TensorCores sharing the "parallel" batch axis: once the batch is big
    # enough that a second grid step is worth its ~0.35us overhead, make sure there
    # are at least 2 (balanced) tiles.
    if b_pad >= 1024 and pl.cdiv(b_pad, tb) < 2:
        tb = _round_up(pl.cdiv(b_pad, 2), BF16_ROWS)
    n_tiles = pl.cdiv(b_pad, tb)

    # Per-call input prep: a single cast (plus a zero-pad only when shapes need it).
    x_bf = x.astype(jnp.bfloat16)
    if (B, state_dim) != (b_pad, k1p):
        x_in = jnp.zeros((b_pad, k1p), jnp.bfloat16).at[:B, :state_dim].set(x_bf)
    else:
        x_in = x_bf

    flops = 2 * b_pad * (k1p * HIDDEN + HIDDEN * HIDDEN + HIDDEN * LANES)
    bytes_accessed = (x_in.size * 2 + w_blob.size * 2 + b_blob.size * 4
                      + b_pad * LANES * 2)

    out = pl.pallas_call(
        functools.partial(dqn3_kernel, k1p=k1p),
        out_shape=jax.ShapeDtypeStruct((b_pad, LANES), jnp.bfloat16),
        grid_spec=pltpu.PrefetchScalarGridSpec(
            num_scalar_prefetch=0,
            grid=(n_tiles,),
            in_specs=[
                pl.BlockSpec((tb, k1p), lambda i: (i, 0)),     # x: tiled over batch
                pl.BlockSpec((kw, LANES), lambda i: (0, 0)),   # weights: VMEM-resident
                pl.BlockSpec((8, LANES), lambda i: (0, 0)),    # biases: VMEM-resident
            ],
            out_specs=pl.BlockSpec((tb, LANES), lambda i: (i, 0)),
        ),
        compiler_params=pltpu.CompilerParams(
            dimension_semantics=("parallel",)),
        cost_estimate=pl.CostEstimate(
            flops=flops, transcendentals=0, bytes_accessed=bytes_accessed),
    )(x_in, w_blob, b_blob)

    if not slice_output:
        return out
    # Module semantics: [B, action_dim] float32. In production, prefer
    # slice_output=False and fuse the lane-indexing into the consumer.
    return out[:B, :action_dim].astype(jnp.float32)


def make_dqn3_forward(params, state_dim, *, block_b=1024):
    """Pack parameters once and return a jitted forward closure (hot path = kernel only)."""
    w_blob, b_blob, k1p, action_dim = pack_params(params, state_dim)
    w_blob = jax.device_put(w_blob)
    b_blob = jax.device_put(b_blob)

    @jax.jit
    def forward(x):
        return dqn3_forward(x, w_blob, b_blob, k1p=k1p, action_dim=action_dim,
                            block_b=block_b)

    return forward


def init_params(key, state_dim, action_dim, hidden_dim=128):
    """Deterministic init mimicking PyTorch Linear default (uniform +-1/sqrt(fan_in)).
    Weights stored as [in, out] so the kernel computes y = x @ W + b."""
    ks = jax.random.split(key, 6)

    def lin(kw, kb, fan_in, fan_out):
        bound = 1.0 / jnp.sqrt(jnp.float32(fan_in))
        w = jax.random.uniform(kw, (fan_in, fan_out), jnp.float32, -bound, bound)
        b = jax.random.uniform(kb, (1, fan_out), jnp.float32, -bound, bound)
        return w, b

    w1, b1 = lin(ks[0], ks[1], state_dim, hidden_dim)
    w2, b2 = lin(ks[2], ks[3], hidden_dim, hidden_dim)
    w3, b3 = lin(ks[4], ks[5], hidden_dim, action_dim)
    return {"w1": w1, "b1": b1, "w2": w2, "b2": b2, "w3": w3, "b3": b3}


def dqn3_reference_f32(x, p):
    h1 = jnp.maximum(x @ p["w1"] + p["b1"], 0.0)
    h2 = jnp.maximum(h1 @ p["w2"] + p["b2"], 0.0)
    return h2 @ p["w3"] + p["b3"]


def dqn3_reference_bf16(x, p):
    bf = jnp.bfloat16
    f32 = jnp.float32
    h1 = jnp.maximum(
        jnp.dot(x.astype(bf), p["w1"].astype(bf), preferred_element_type=f32) + p["b1"], 0.0)
    h2 = jnp.maximum(
        jnp.dot(h1.astype(bf), p["w2"].astype(bf), preferred_element_type=f32) + p["b2"], 0.0)
    return jnp.dot(h2.astype(bf), p["w3"].astype(bf), preferred_element_type=f32) + p["b3"]


if __name__ == "__main__":
    key = jax.random.PRNGKey(0)
    k_params, k_x = jax.random.split(key)

    # Snake-style DQN: small state vector, few actions.
    batch, state_dim, action_dim, hidden_dim = 8, 16, 4, 128

    params = init_params(k_params, state_dim, action_dim, hidden_dim)
    x = jax.random.normal(k_x, (batch, state_dim), jnp.float32)

    forward = make_dqn3_forward(params, state_dim)   # packs weights ONCE
    out = jax.block_until_ready(forward(x))
    assert out.shape == (batch, action_dim)

    # Check against a bf16-matched reference (same casts, f32 accumulation); the
    # kernel additionally rounds the output to bf16, hence the ~1e-2 tolerance.
    ref_bf16 = dqn3_reference_bf16(x, params)
    assert jnp.allclose(out, ref_bf16, atol=2e-2, rtol=2e-2)

    # Loose check against the pure-f32 reference (bf16 rounding only).
    ref_f32 = dqn3_reference_f32(x, params)
    assert jnp.allclose(out, ref_f32, atol=6e-2, rtol=6e-2)

    print("KERNEL_OK")
</pallas_src>

<mosaic_0001>
module attributes {stable_mosaic.version = 11 : i64} {
  func.func @dqn3_kernel(%arg0: i32, %arg1: memref<16x16xbf16, #tpu.memory_space<vmem>>, %arg2: memref<272x128xbf16, #tpu.memory_space<vmem>>, %arg3: memref<8x128xf32, #tpu.memory_space<vmem>>, %arg4: memref<16x128xbf16, #tpu.memory_space<vmem>>) attributes {dimension_semantics = [#tpu.dimension_semantics<parallel>], iteration_bounds = array<i64: 1>, scalar_prefetch = 0 : i64, scratch_operands = 0 : i64, tpu.core_type = #tpu.core_type<tc>, window_params = [{transform_indices = @transform_0, window_bounds = array<i64: 16, 16>}, {pipeline_mode = #tpu.pipeline_mode<synchronous>, transform_indices = @transform_1, window_bounds = array<i64: 272, 128>}, {pipeline_mode = #tpu.pipeline_mode<synchronous>, transform_indices = @transform_2, window_bounds = array<i64: 8, 128>}, {transform_indices = @transform_3, window_bounds = array<i64: 16, 128>}]} {
    %c0 = arith.constant 0 : index
    %c0_0 = arith.constant 0 : index
    %0 = vector.load %arg1[%c0, %c0_0] : memref<16x16xbf16, #tpu.memory_space<vmem>>, vector<16x16xbf16>
    %c0_1 = arith.constant 0 : index
    %c0_2 = arith.constant 0 : index
    %1 = vector.load %arg2[%c0_1, %c0_2] : memref<272x128xbf16, #tpu.memory_space<vmem>>, vector<16x128xbf16>
    %c16 = arith.constant 16 : index
    %c0_3 = arith.constant 0 : index
    %2 = vector.load %arg2[%c16, %c0_3] : memref<272x128xbf16, #tpu.memory_space<vmem>>, vector<128x128xbf16>
    %c144 = arith.constant 144 : index
    %c0_4 = arith.constant 0 : index
    %3 = vector.load %arg2[%c144, %c0_4] : memref<272x128xbf16, #tpu.memory_space<vmem>>, vector<128x128xbf16>
    %c0_5 = arith.constant 0 : index
    %c0_6 = arith.constant 0 : index
    %4 = vector.load %arg3[%c0_5, %c0_6] : memref<8x128xf32, #tpu.memory_space<vmem>>, vector<1x128xf32>
    %c1 = arith.constant 1 : index
    %c0_7 = arith.constant 0 : index
    %5 = vector.load %arg3[%c1, %c0_7] : memref<8x128xf32, #tpu.memory_space<vmem>>, vector<1x128xf32>
    %c2 = arith.constant 2 : index
    %c0_8 = arith.constant 0 : index
    %6 = vector.load %arg3[%c2, %c0_8] : memref<8x128xf32, #tpu.memory_space<vmem>>, vector<1x128xf32>
    %cst = arith.constant dense<0.000000e+00> : vector<16x128xf32>
    %7 = tpu.matmul %0, %1, %cst {dimension_numbers = #tpu.dot_dimension_numbers<[1], [0], [0], [1], [0, 0, 1, 1], [], []>} : vector<16x16xbf16>, vector<16x128xbf16>, vector<16x128xf32> -> vector<16x128xf32>
    %8 = vector.broadcast %4 : vector<1x128xf32> to vector<16x128xf32>
    %9 = arith.addf %7, %8 : vector<16x128xf32>
    %cst_9 = arith.constant 0.000000e+00 : f32
    %10 = vector.broadcast %cst_9 : f32 to vector<16x128xf32>
    %11 = arith.maximumf %9, %10 : vector<16x128xf32>
    %12 = arith.truncf %11 : vector<16x128xf32> to vector<16x128xbf16>
    %cst_10 = arith.constant dense<0.000000e+00> : vector<16x128xf32>
    %13 = tpu.matmul %12, %2, %cst_10 {dimension_numbers = #tpu.dot_dimension_numbers<[1], [0], [0], [1], [0, 0, 1, 1], [], []>} : vector<16x128xbf16>, vector<128x128xbf16>, vector<16x128xf32> -> vector<16x128xf32>
    %14 = vector.broadcast %5 : vector<1x128xf32> to vector<16x128xf32>
    %15 = arith.addf %13, %14 : vector<16x128xf32>
    %cst_11 = arith.constant 0.000000e+00 : f32
    %16 = vector.broadcast %cst_11 : f32 to vector<16x128xf32>
    %17 = arith.maximumf %15, %16 : vector<16x128xf32>
    %18 = arith.truncf %17 : vector<16x128xf32> to vector<16x128xbf16>
    %cst_12 = arith.constant dense<0.000000e+00> : vector<16x128xf32>
    %19 = tpu.matmul %18, %3, %cst_12 {dimension_numbers = #tpu.dot_dimension_numbers<[1], [0], [0], [1], [0, 0, 1, 1], [], []>} : vector<16x128xbf16>, vector<128x128xbf16>, vector<16x128xf32> -> vector<16x128xf32>
    %20 = vector.broadcast %6 : vector<1x128xf32> to vector<16x128xf32>
    %21 = arith.addf %19, %20 : vector<16x128xf32>
    %22 = arith.truncf %21 : vector<16x128xf32> to vector<16x128xbf16>
    %c0_13 = arith.constant 0 : index
    %c0_14 = arith.constant 0 : index
    %23 = vector.load %arg4[%c0_13, %c0_14] : memref<16x128xbf16, #tpu.memory_space<vmem>>, vector<16x128xbf16>
    tpu.vector_store %arg4[%c0_13, %c0_14], %22 {strides = array<i32>} : memref<16x128xbf16, #tpu.memory_space<vmem>>, vector<16x128xbf16>,
    return
  }
  func.func @transform_0(%arg0: i32) -> (i32, i32) {
    %c0_i32 = arith.constant 0 : i32
    %c0_i32_0 = arith.constant 0 : i32
    return %arg0, %c0_i32 : i32, i32
  }
  func.func @transform_1(%arg0: i32) -> (i32, i32) {
    %c0_i32 = arith.constant 0 : i32
    %c0_i32_0 = arith.constant 0 : i32
    %c0_i32_1 = arith.constant 0 : i32
    return %c0_i32, %c0_i32_0 : i32, i32
  }
  func.func @transform_2(%arg0: i32) -> (i32, i32) {
    %c0_i32 = arith.constant 0 : i32
    %c0_i32_0 = arith.constant 0 : i32
    %c0_i32_1 = arith.constant 0 : i32
    return %c0_i32, %c0_i32_0 : i32, i32
  }
  func.func @transform_3(%arg0: i32) -> (i32, i32) {
    %c0_i32 = arith.constant 0 : i32
    %c0_i32_0 = arith.constant 0 : i32
    return %arg0, %c0_i32 : i32, i32
  }
}

</mosaic_0001>

<bundles_post_ra>
// kernel: forward.1
= control target key start
LH: loop header
LB: loop body
LE: loop exit
PB: predicated region body
PF: predicated region fallthrough
CT: control target
= control target key end

     0   :  { %8 = vsyncpa [#allocation3], 0  ;;  %s369_s15 = smov [#allocation2]   ;;  %s370_s17 = smov 64   ;;  %s410_s0 = inlined_call_operand.vmem [shape: bf16[16,16], index: 0, kind: input, shape index: {}]   ;;  %s411_s1 = inlined_call_operand.hbm [shape: bf16[272,128], index: 1, kind: input, shape index: {}]   ;;  %s412_s2 = inlined_call_operand.vmem [shape: f32[8,128], index: 2, kind: input, shape index: {}]   ;;  %s413_s3 = inlined_call_operand.vmem [shape: bf16[16,128], index: 3, kind: output, shape index: {}]  }
   0x1   :  { %s15_s14 = sshll.u32 %s411_s1, 4  ;;  %s17_s16 = sshll.u32 %s369_s15, 4  ;;  %s16_s14 = int_to_ptr.hbm [resolvable:$true] %s15_s14  ;;  %s18_s16 = int_to_ptr.vmem [resolvable:$true] %s17_s16 }
   0x2   :  { %s371_s18 = smov 4  }
   0x3   :  { %23 = dma.hbm_to_vmem [thread:$0]  %s16_s14, 2176, %s18_s16, [#allocation3], %s370_s17, %s370_s17, %s371_s18  }
   0x4   :  { %367 = dma.done.wait [#allocation3], 2176  }
   0x5   :  { %368 = vsyncadd [#allocation3], 4294965120  ;;  %v315_v0 = vld [vmem:[#allocation2] sm:$0xff]  ;;  %vm82_vm0 = vcmask 130048   ;;  %v322_v3 = vld [vmem:[#allocation2 + $0x38] sm:$0xff] }
   0x6   :  { %v323_v1 = vld [vmem:[#allocation2 + $0x40] sm:$0xff]  ;;  %93 = vmatpush.bf16.msra.mxu0 %v315_v0  ;;  %v321_v4 = vld [vmem:[#allocation2 + $0x30] sm:$0xff]  ;;  %v320_v5 = vld [vmem:[#allocation2 + $0x28] sm:$0xff] }
   0x7   :  { %v314_v2 = vld [vmem:[%s410_s0] sm:$0xff]  ;;  %152 = vmatpush.bf16.msra.mxu1 %v323_v1  ;;  %v318_v7 = vld [vmem:[#allocation2 + $0x18] sm:$0xff]  ;;  %v317_v8 = vld [vmem:[#allocation2 + $0x10] sm:$0xff] }
   0x8   :  { %v319_v6 = vld [vmem:[#allocation2 + $0x20] sm:$0xff]  ;;  %v316_v9 = vld [vmem:[#allocation2 + $0x8] sm:$0xff]  ;;  %v330_v11 = vld [vmem:[#allocation2 + $0x78] sm:$0xff] }
   0x9   :  { %249 = vmatmul.msk.bf16.vlgmr.msra.gmra.mxu0 %vm82_vm0, %v314_v2  ;;  %v331_v10 = vld [vmem:[#allocation2 + $0x80] sm:$0xff]  ;;  %v329_v12 = vld [vmem:[#allocation2 + $0x70] sm:$0xff]  ;;  %v328_v13 = vld [vmem:[#allocation2 + $0x68] sm:$0xff] }
   0xa   :  { %218 = vmatpush.bf16.msra.mxu2 %v331_v10  ;;  %v340_v15 = vld [vmem:[%s412_s2] ss:$0 sm:$0xff]  ;;  %v326_v23 = vld [vmem:[#allocation2 + $0x58] sm:$0xff]  ;;  %v325_v24 = vld [vmem:[#allocation2 + $0x50] sm:$0xff] }
   0xb   :  { %153 = vmatpush.bf16.msra.mxu1 %v322_v3  ;;  %v327_v22 = vld [vmem:[#allocation2 + $0x60] sm:$0xff]  ;;  %v324_v25 = vld [vmem:[#allocation2 + $0x48] sm:$0xff] }
   0xc   :  { %v341_v27 = vld [vmem:[%s412_s2 + $0x1] ss:$0 sm:$0xff]  ;;  %v342_v35 = vld [vmem:[%s412_s2 + $0x2] ss:$0 sm:$0xff] }
   0xe   :  { %219 = vmatpush.bf16.msra.mxu2 %v330_v11 }
   0xf   :  { %154 = vmatpush.bf16.msra.mxu1 %v321_v4 }
  0x12   :  { %220 = vmatpush.bf16.msra.mxu2 %v329_v12 }
  0x13   :  { %155 = vmatpush.bf16.msra.mxu1 %v320_v5 }
  0x16   :  { %221 = vmatpush.bf16.msra.mxu2 %v328_v13 }
  0x17   :  { %156 = vmatpush.bf16.msra.mxu1 %v319_v6 }
  0x1a   :  { %222 = vmatpush.bf16.msra.mxu2 %v327_v22 }
  0x1b   :  { %157 = vmatpush.bf16.msra.mxu1 %v318_v7 }
  0x1e   :  { %223 = vmatpush.bf16.msra.mxu2 %v326_v23 }
  0x1f   :  { %158 = vmatpush.bf16.msra.mxu1 %v317_v8 }
  0x22   :  { %224 = vmatpush.bf16.msra.mxu2 %v325_v24 }
  0x23   :  { %159 = vmatpush.bf16.msra.mxu1 %v316_v9 }
  0x26   :  { %225 = vmatpush.bf16.msra.mxu2 %v324_v25 }
  0x86   :  { %v95_v14 = vpop.f32.mrf.mxu0 }
  0x87   :  { %v96_v16 = vadd.f32 %v340_v15, %v95_v14 }
  0x89   :  { %v100_v19 = vmax.f32 %v96_v16, 0.0 }
  0x8e   :  { %v97_v17 = vpop.f32.mrf.mxu0 }
  0x8f   :  { %v98_v18 = vadd.f32 %v340_v15, %v97_v17 }
  0x91   :  { %v101_v20 = vmax.f32 %v98_v18, 0.0 }
  0x93   :  { %v102_v21 = vpack.c.bf16 %v101_v20, %v100_v19 }
  0x95   :  { %160 = vmatmul.bf16.vlgmr.msra.gmra.mxu1 %v102_v21 }
 0x112   :  { %v161_v26 = vpop.f32.mrf.mxu1 }
 0x113   :  { %v162_v28 = vadd.f32 %v341_v27, %v161_v26 }
 0x115   :  { %v166_v31 = vmax.f32 %v162_v28, 0.0 }
 0x11a   :  { %v163_v29 = vpop.f32.mrf.mxu1 }
 0x11b   :  { %v164_v30 = vadd.f32 %v341_v27, %v163_v29 }
 0x11d   :  { %v167_v32 = vmax.f32 %v164_v30, 0.0 }
 0x11f   :  { %v168_v33 = vpack.c.bf16 %v167_v32, %v166_v31 }
 0x121   :  { %226 = vmatmul.bf16.vlgmr.msra.gmra.mxu2 %v168_v33 }
 0x1a4   :  { %v227_v34 = vpop.f32.mrf.mxu2 }
 0x1a5   :  { %v228_v37 = vadd.f32 %v342_v35, %v227_v34 }
 0x1ac   :  { %v229_v36 = vpop.f32.mrf.mxu2 }
 0x1ad   :  { %v230_v38 = vadd.f32 %v342_v35, %v229_v36 }
 0x1af   :  { %v335_v39 = vpack.c.bf16 %v230_v38, %v228_v37 }
 0x1b1   :  { %336 = vst [vmem:[%s413_s3] sm:$0xff] %v335_v39  }
 0x1b2   :  { %240 = vsyncpa [#allocation3], 1 }

</bundles_post_ra>
